<compile_context>
chip_gen: v5e
topology: v5e:2x2
jax: 0.10.0
libtpu: 0.0.40
codegen_flags: <defaults>
</compile_context>

<pallas_src>
import functools

import jax
import jax.numpy as jnp
import numpy as np
from jax.experimental import pallas as pl
from jax.experimental.pallas import tpu as pltpu


def _round_up(a: int, b: int) -> int:
    return (a + b - 1) // b * b


def _sage_layer_kernel(a_ref, xs_ref, xr_ref, dinv_ref, wl_ref, wr_ref, b_ref,
                       o_ref, acc_ref, *, apply_relu: bool, tk: int, x_resident: bool):
    """One SAGEConv layer, tiled over (target-row tiles, source/contraction tiles).

    a_ref    : (tm, tk)        bf16  adjacency edge-count tile
    xs_ref   : (n_x|tk, Hin)   bf16  source-node features (resident or per-k tile)
    xr_ref   : (tm, Hin)       bf16  target-node features (root/self term)
    dinv_ref : (tm, 1)         f32   1 / max(deg, 1) for the target rows
    wl_ref   : (Hin, Hout)     bf16  neighbor weight, pre-transposed to [in, out]
    wr_ref   : (Hin, Hout)     bf16  root weight, pre-transposed to [in, out]
    b_ref    : (1, Hout)       f32   bias
    o_ref    : (tm, Hout)            output tile (resident across the contraction axis)
    acc_ref  : (tm, Hin)       f32   VMEM accumulator for A_counts @ X
    """
    k = pl.program_id(1)

    @pl.when(k == 0)
    def _():
        acc_ref[...] = jnp.zeros_like(acc_ref)

    if x_resident:
        start = pl.multiple_of(k * tk, 128)
        xs = xs_ref[pl.ds(start, tk), :]
    else:
        xs = xs_ref[...]

    # O(N^2) part: bf16 operands on the MXU, f32 accumulation.
    acc_ref[...] += jnp.dot(a_ref[...], xs, preferred_element_type=jnp.float32)

    @pl.when(k == pl.num_programs(1) - 1)
    def _():
        # mean aggregation: apply f32 1/deg once, then bf16 MXU dots.
        agg = (acc_ref[...] * dinv_ref[...]).astype(jnp.bfloat16)
        out = (jnp.dot(agg, wl_ref[...], preferred_element_type=jnp.float32)
               + jnp.dot(xr_ref[...], wr_ref[...], preferred_element_type=jnp.float32)
               + b_ref[...])
        if apply_relu:
            out = jnp.maximum(out, 0.0)
        o_ref[...] = out.astype(o_ref.dtype)


def _sage_layer(adj, x_feat, inv_deg, wl, wr, b, *, apply_relu, tm, tk, out_dtype,
                x_resident, vmem_limit_bytes):
    n_rows, n_cols = adj.shape
    hin = x_feat.shape[1]
    hout = wl.shape[1]
    grid = (n_rows // tm, n_cols // tk)

    if x_resident:
        # Constant index_map -> fetched once, stays VMEM-resident across the grid.
        xs_spec = pl.BlockSpec((x_feat.shape[0], hin), lambda i, k: (0, 0))
    else:
        xs_spec = pl.BlockSpec((tk, hin), lambda i, k: (k, 0))

    kernel = functools.partial(_sage_layer_kernel, apply_relu=apply_relu,
                               tk=tk, x_resident=x_resident)
    return pl.pallas_call(
        kernel,
        out_shape=jax.ShapeDtypeStruct((n_rows, hout), out_dtype),
        grid_spec=pltpu.PrefetchScalarGridSpec(
            num_scalar_prefetch=0,
            grid=grid,
            in_specs=[
                pl.BlockSpec((tm, tk), lambda i, k: (i, k)),      # A counts (bf16)
                xs_spec,                                          # X source rows (bf16)
                pl.BlockSpec((tm, hin), lambda i, k: (i, 0)),     # X target rows (bf16)
                pl.BlockSpec((tm, 1), lambda i, k: (i, 0)),       # 1/deg (f32)
                pl.BlockSpec((hin, hout), lambda i, k: (0, 0)),   # W_l [in, out] (bf16)
                pl.BlockSpec((hin, hout), lambda i, k: (0, 0)),   # W_r [in, out] (bf16)
                pl.BlockSpec((1, hout), lambda i, k: (0, 0)),     # bias (f32)
            ],
            out_specs=pl.BlockSpec((tm, hout), lambda i, k: (i, 0)),
            scratch_shapes=[pltpu.VMEM((tm, hin), jnp.float32)],
        ),
        compiler_params=pltpu.CompilerParams(
            dimension_semantics=("parallel", "arbitrary"),
            vmem_limit_bytes=vmem_limit_bytes),
    )(adj, x_feat, x_feat, inv_deg, wl, wr, b)


def _pick_tiles(n: int):
    """Generation-aware tile sizes for the (rows, contraction) tiling of A."""
    n128 = _round_up(max(n, 1), 128)
    if n128 <= 512:
        # Tiny graphs: one contraction tile; keep the single DMA small.
        return min(256, n128), n128
    try:
        vmem_cap = int(getattr(pltpu.get_tpu_info(), "vmem_capacity_bytes", 64 << 20))
    except Exception:  # pragma: no cover - conservative fallback off-TPU
        vmem_cap = 64 << 20
    if vmem_cap >= (96 << 20):   # v5e / v6e: 128 MiB physical VMEM
        tm, tk = 1024, 4096      # bf16 A tile = 8 MiB (16 MiB double-buffered)
    else:                        # v7x: 64 MiB per-TC VMEM
        tm, tk = 512, 4096       # bf16 A tile = 4 MiB (8 MiB double-buffered)
    while tm > 128 and tm > n128:
        tm //= 2
    while tk > 128 and tk > n128:
        tk //= 2
    # Keep >= 2 row tiles so both v7x TensorCores get work under "parallel".
    while tm > 128 and pl.cdiv(n, tm) < 2:
        tm //= 2
    return tm, tk


def _vmem_estimate_bytes(tm, tk, hin, hout, n_x_rows, x_resident):
    a = 2 * tm * tk * 2                                   # A, double-buffered bf16
    xs = 2 * (n_x_rows if x_resident else tk) * hin * 2   # source features
    xr = 2 * tm * hin * 2                                 # root features
    dinv = 2 * tm * 128 * 4                               # 1/deg (lane-padded)
    w = 2 * 2 * hin * hout * 2                            # W_l, W_r
    bias = 2 * 8 * hout * 4
    out = 2 * tm * hout * 4
    acc = tm * hin * 4
    return a + xs + xr + dinv + w + bias + out + acc


def _pad2(a, rows, cols, dtype):
    a = jnp.asarray(a, jnp.float32)
    out = jnp.zeros((rows, cols), jnp.float32).at[:a.shape[0], :a.shape[1]].set(a)
    return out.astype(dtype)


def gnn_forward(x, edge_index, params, *, tm=None, tk=None):
    """x: (N, hidden) f32; edge_index: (2, E) int32, [src; dst] (messages flow src -> dst)."""
    n, h = x.shape
    out_c = params["w2l"].shape[0]
    hp = _round_up(h, 128)        # lane-dense hidden dim
    op = _round_up(out_c, 128)    # lane-dense output dim

    auto_tm, auto_tk = _pick_tiles(n)
    tm = auto_tm if tm is None else tm
    tk = auto_tk if tk is None else tk

    # Independent row/column padding (no lcm blow-up).
    n_rows = _round_up(max(n, 1), tm)
    n_cols = _round_up(max(n, 1), tk)
    n_x = max(n_rows, n_cols)

    # --- glue (plain XLA): adjacency edge counts + f32 inverse degree ---
    src = edge_index[0]
    dst = edge_index[1]
    counts = jnp.zeros((n_rows, n_cols), jnp.float32).at[dst, src].add(1.0)  # A[t, s]
    deg = jnp.sum(counts, axis=1, keepdims=True)
    inv_deg = 1.0 / jnp.maximum(deg, 1.0)              # zero-degree rows: agg stays 0
    adj = counts.astype(jnp.bfloat16)                  # small integer counts are exact in bf16

    # --- glue: lane-dense, bf16 features / weights ([in, out] layout), f32 bias ---
    x_p = _pad2(x, n_x, hp, jnp.bfloat16)
    w1l = _pad2(params["w1l"].T, hp, hp, jnp.bfloat16)
    w1r = _pad2(params["w1r"].T, hp, hp, jnp.bfloat16)
    b1 = _pad2(params["b1"].reshape(1, -1), 1, hp, jnp.float32)
    w2l = _pad2(params["w2l"].T, hp, op, jnp.bfloat16)
    w2r = _pad2(params["w2r"].T, hp, op, jnp.bfloat16)
    b2 = _pad2(params["b2"].reshape(1, -1), 1, op, jnp.float32)

    # Keep the full source-feature matrix VMEM-resident when its double-buffer fits.
    x_resident = (2 * n_x * hp * 2) <= (16 << 20)

    vmem_limit = _vmem_estimate_bytes(tm, tk, hp, max(hp, op), n_x, x_resident)
    vmem_limit = min(100 << 20, max(32 << 20, int(1.5 * vmem_limit)))

    h1 = _sage_layer(adj, x_p, inv_deg, w1l, w1r, b1, apply_relu=True,
                     tm=tm, tk=tk, out_dtype=jnp.bfloat16,
                     x_resident=x_resident, vmem_limit_bytes=vmem_limit)
    if n_x > n_rows:
        # Layer-2 source features must cover the (zero) padded columns of A.
        h1 = jnp.zeros((n_x, hp), jnp.bfloat16).at[:n_rows, :].set(h1)
    h2 = _sage_layer(adj, h1, inv_deg, w2l, w2r, b2, apply_relu=False,
                     tm=tm, tk=tk, out_dtype=jnp.float32,
                     x_resident=x_resident, vmem_limit_bytes=vmem_limit)
    return h2[:n, :out_c]


def _reference_np(x, edge_index, params):
    """Pure numpy f32 reference of the PyG-style 2-layer SAGEConv forward."""
    x = np.asarray(x, np.float32)
    src = np.asarray(edge_index[0])
    dst = np.asarray(edge_index[1])
    n = x.shape[0]
    adj = np.zeros((n, n), np.float32)
    np.add.at(adj, (dst, src), 1.0)
    deg = adj.sum(axis=1, keepdims=True)
    adj = adj / np.maximum(deg, 1.0)
    w1l = np.asarray(params["w1l"], np.float32)
    w1r = np.asarray(params["w1r"], np.float32)
    b1 = np.asarray(params["b1"], np.float32)
    w2l = np.asarray(params["w2l"], np.float32)
    w2r = np.asarray(params["w2r"], np.float32)
    b2 = np.asarray(params["b2"], np.float32)
    h = adj @ x @ w1l.T + b1 + x @ w1r.T
    h = np.maximum(h, 0.0)
    return adj @ h @ w2l.T + b2 + h @ w2r.T


if __name__ == "__main__":
    hidden_channels = 32
    output_channels = 8
    num_nodes = 16
    num_edges = 40

    key = jax.random.PRNGKey(0)
    kx, ke, k1, k2, k3, k4, k5 = jax.random.split(key, 7)

    x = jax.random.normal(kx, (num_nodes, hidden_channels), jnp.float32)
    edge_index = jax.random.randint(ke, (2, num_edges), 0, num_nodes, jnp.int32)

    # Deterministic synthetic parameters (PyTorch Linear weight layout: [out, in]).
    scale = 1.0 / np.sqrt(hidden_channels)
    params = {
        "w1l": scale * jax.random.normal(k1, (hidden_channels, hidden_channels), jnp.float32),
        "w1r": scale * jax.random.normal(k2, (hidden_channels, hidden_channels), jnp.float32),
        "b1":  jnp.zeros((hidden_channels,), jnp.float32),
        "w2l": scale * jax.random.normal(k3, (output_channels, hidden_channels), jnp.float32),
        "w2r": scale * jax.random.normal(k4, (output_channels, hidden_channels), jnp.float32),
        "b2":  0.01 * jax.random.normal(k5, (output_channels,), jnp.float32),
    }

    out = gnn_forward(x, edge_index, params)
    jax.block_until_ready(out)

    ref = _reference_np(x, edge_index, params)
    # bf16 features / bf16 MXU operands (with f32 accumulation and f32 1/deg) bound the error.
    np.testing.assert_allclose(np.asarray(out), ref, rtol=3e-2, atol=3e-2)

    print("KERNEL_OK")
</pallas_src>

<mosaic_0001>
module attributes {stable_mosaic.version = 11 : i64} {
  func.func @_sage_layer_kernel(%arg0: i32, %arg1: i32, %arg2: memref<128x128xbf16, #tpu.memory_space<vmem>>, %arg3: memref<128x128xbf16, #tpu.memory_space<vmem>>, %arg4: memref<128x128xbf16, #tpu.memory_space<vmem>>, %arg5: memref<128x1xf32, #tpu.memory_space<vmem>>, %arg6: memref<128x128xbf16, #tpu.memory_space<vmem>>, %arg7: memref<128x128xbf16, #tpu.memory_space<vmem>>, %arg8: memref<1x128xf32, #tpu.memory_space<vmem>>, %arg9: memref<128x128xbf16, #tpu.memory_space<vmem>>, %arg10: memref<128x128xf32, #tpu.memory_space<vmem>>) attributes {dimension_semantics = [#tpu.dimension_semantics<parallel>, #tpu.dimension_semantics<arbitrary>], iteration_bounds = array<i64: 1, 1>, scalar_prefetch = 0 : i64, scratch_operands = 1 : i64, tpu.core_type = #tpu.core_type<tc>, window_params = [{transform_indices = @transform_0, window_bounds = array<i64: 128, 128>}, {pipeline_mode = #tpu.pipeline_mode<synchronous>, transform_indices = @transform_1, window_bounds = array<i64: 128, 128>}, {transform_indices = @transform_2, window_bounds = array<i64: 128, 128>}, {transform_indices = @transform_3, window_bounds = array<i64: 128, 1>}, {pipeline_mode = #tpu.pipeline_mode<synchronous>, transform_indices = @transform_4, window_bounds = array<i64: 128, 128>}, {pipeline_mode = #tpu.pipeline_mode<synchronous>, transform_indices = @transform_5, window_bounds = array<i64: 128, 128>}, {pipeline_mode = #tpu.pipeline_mode<synchronous>, transform_indices = @transform_6, window_bounds = array<i64: 1, 128>}, {transform_indices = @transform_7, window_bounds = array<i64: 128, 128>}]} {
    %c0_i32 = arith.constant 0 : i32
    %0 = arith.cmpi eq, %arg1, %c0_i32 : i32
    %1 = arith.extui %0 : i1 to i32
    %c0_i32_0 = arith.constant 0 : i32
    %2 = arith.cmpi ne, %1, %c0_i32_0 : i32
    scf.if %2 {
      %cst_9 = arith.constant 0.000000e+00 : f32
      %15 = vector.broadcast %cst_9 : f32 to vector<128x128xf32>
      %c0_10 = arith.constant 0 : index
      %c0_11 = arith.constant 0 : index
      %16 = vector.load %arg10[%c0_10, %c0_11] : memref<128x128xf32, #tpu.memory_space<vmem>>, vector<128x128xf32>
      tpu.vector_store %arg10[%c0_10, %c0_11], %15 {strides = array<i32>} : memref<128x128xf32, #tpu.memory_space<vmem>>, vector<128x128xf32>,
    } else {
    }
    %c128_i32 = arith.constant 128 : i32
    %3 = arith.muli %arg1, %c128_i32 : i32
    %4 = tpu.assume_multiple %3, 128 : i32
    %5 = arith.index_cast %4 : i32 to index
    %c0 = arith.constant 0 : index
    %6 = vector.load %arg3[%5, %c0] : memref<128x128xbf16, #tpu.memory_space<vmem>>, vector<128x128xbf16>
    %c0_1 = arith.constant 0 : index
    %c0_2 = arith.constant 0 : index
    %7 = vector.load %arg10[%c0_1, %c0_2] : memref<128x128xf32, #tpu.memory_space<vmem>>, vector<128x128xf32>
    %c0_3 = arith.constant 0 : index
    %c0_4 = arith.constant 0 : index
    %8 = vector.load %arg2[%c0_3, %c0_4] : memref<128x128xbf16, #tpu.memory_space<vmem>>, vector<128x128xbf16>
    %cst = arith.constant dense<0.000000e+00> : vector<128x128xf32>
    %9 = tpu.matmul %8, %6, %cst {dimension_numbers = #tpu.dot_dimension_numbers<[1], [0], [0], [1], [0, 0, 1, 1], [], []>} : vector<128x128xbf16>, vector<128x128xbf16>, vector<128x128xf32> -> vector<128x128xf32>
    %10 = arith.addf %7, %9 : vector<128x128xf32>
    %c0_5 = arith.constant 0 : index
    %c0_6 = arith.constant 0 : index
    %11 = vector.load %arg10[%c0_5, %c0_6] : memref<128x128xf32, #tpu.memory_space<vmem>>, vector<128x128xf32>
    tpu.vector_store %arg10[%c0_5, %c0_6], %10 {strides = array<i32>} : memref<128x128xf32, #tpu.memory_space<vmem>>, vector<128x128xf32>,
    %c0_i32_7 = arith.constant 0 : i32
    %12 = arith.cmpi eq, %arg1, %c0_i32_7 : i32
    %13 = arith.extui %12 : i1 to i32
    %c0_i32_8 = arith.constant 0 : i32
    %14 = arith.cmpi ne, %13, %c0_i32_8 : i32
    scf.if %14 {
      %c0_9 = arith.constant 0 : index
      %c0_10 = arith.constant 0 : index
      %15 = vector.load %arg10[%c0_9, %c0_10] : memref<128x128xf32, #tpu.memory_space<vmem>>, vector<128x128xf32>
      %c0_11 = arith.constant 0 : index
      %c0_12 = arith.constant 0 : index
      %16 = vector.load %arg5[%c0_11, %c0_12] : memref<128x1xf32, #tpu.memory_space<vmem>>, vector<128x1xf32>
      %17 = vector.broadcast %16 : vector<128x1xf32> to vector<128x128xf32>
      %18 = arith.mulf %15, %17 : vector<128x128xf32>
      %19 = arith.truncf %18 : vector<128x128xf32> to vector<128x128xbf16>
      %c0_13 = arith.constant 0 : index
      %c0_14 = arith.constant 0 : index
      %20 = vector.load %arg6[%c0_13, %c0_14] : memref<128x128xbf16, #tpu.memory_space<vmem>>, vector<128x128xbf16>
      %cst_15 = arith.constant dense<0.000000e+00> : vector<128x128xf32>
      %21 = tpu.matmul %19, %20, %cst_15 {dimension_numbers = #tpu.dot_dimension_numbers<[1], [0], [0], [1], [0, 0, 1, 1], [], []>} : vector<128x128xbf16>, vector<128x128xbf16>, vector<128x128xf32> -> vector<128x128xf32>
      %c0_16 = arith.constant 0 : index
      %c0_17 = arith.constant 0 : index
      %22 = vector.load %arg4[%c0_16, %c0_17] : memref<128x128xbf16, #tpu.memory_space<vmem>>, vector<128x128xbf16>
      %c0_18 = arith.constant 0 : index
      %c0_19 = arith.constant 0 : index
      %23 = vector.load %arg7[%c0_18, %c0_19] : memref<128x128xbf16, #tpu.memory_space<vmem>>, vector<128x128xbf16>
      %cst_20 = arith.constant dense<0.000000e+00> : vector<128x128xf32>
      %24 = tpu.matmul %22, %23, %cst_20 {dimension_numbers = #tpu.dot_dimension_numbers<[1], [0], [0], [1], [0, 0, 1, 1], [], []>} : vector<128x128xbf16>, vector<128x128xbf16>, vector<128x128xf32> -> vector<128x128xf32>
      %25 = arith.addf %21, %24 : vector<128x128xf32>
      %c0_21 = arith.constant 0 : index
      %c0_22 = arith.constant 0 : index
      %26 = vector.load %arg8[%c0_21, %c0_22] : memref<1x128xf32, #tpu.memory_space<vmem>>, vector<1x128xf32>
      %27 = vector.broadcast %26 : vector<1x128xf32> to vector<128x128xf32>
      %28 = arith.addf %25, %27 : vector<128x128xf32>
      %cst_23 = arith.constant 0.000000e+00 : f32
      %29 = vector.broadcast %cst_23 : f32 to vector<128x128xf32>
      %30 = arith.maximumf %28, %29 : vector<128x128xf32>
      %31 = arith.truncf %30 : vector<128x128xf32> to vector<128x128xbf16>
      %c0_24 = arith.constant 0 : index
      %c0_25 = arith.constant 0 : index
      %32 = vector.load %arg9[%c0_24, %c0_25] : memref<128x128xbf16, #tpu.memory_space<vmem>>, vector<128x128xbf16>
      tpu.vector_store %arg9[%c0_24, %c0_25], %31 {strides = array<i32>} : memref<128x128xbf16, #tpu.memory_space<vmem>>, vector<128x128xbf16>,
    } else {
    }
    return
  }
  func.func @transform_0(%arg0: i32, %arg1: i32) -> (i32, i32) {
    %c0_i32 = arith.constant 0 : i32
    return %arg0, %arg1 : i32, i32
  }
  func.func @transform_1(%arg0: i32, %arg1: i32) -> (i32, i32) {
    %c0_i32 = arith.constant 0 : i32
    %c0_i32_0 = arith.constant 0 : i32
    %c0_i32_1 = arith.constant 0 : i32
    return %c0_i32, %c0_i32_0 : i32, i32
  }
  func.func @transform_2(%arg0: i32, %arg1: i32) -> (i32, i32) {
    %c0_i32 = arith.constant 0 : i32
    %c0_i32_0 = arith.constant 0 : i32
    return %arg0, %c0_i32 : i32, i32
  }
  func.func @transform_3(%arg0: i32, %arg1: i32) -> (i32, i32) {
    %c0_i32 = arith.constant 0 : i32
    %c0_i32_0 = arith.constant 0 : i32
    return %arg0, %c0_i32 : i32, i32
  }
  func.func @transform_4(%arg0: i32, %arg1: i32) -> (i32, i32) {
    %c0_i32 = arith.constant 0 : i32
    %c0_i32_0 = arith.constant 0 : i32
    %c0_i32_1 = arith.constant 0 : i32
    return %c0_i32, %c0_i32_0 : i32, i32
  }
  func.func @transform_5(%arg0: i32, %arg1: i32) -> (i32, i32) {
    %c0_i32 = arith.constant 0 : i32
    %c0_i32_0 = arith.constant 0 : i32
    %c0_i32_1 = arith.constant 0 : i32
    return %c0_i32, %c0_i32_0 : i32, i32
  }
  func.func @transform_6(%arg0: i32, %arg1: i32) -> (i32, i32) {
    %c0_i32 = arith.constant 0 : i32
    %c0_i32_0 = arith.constant 0 : i32
    %c0_i32_1 = arith.constant 0 : i32
    return %c0_i32, %c0_i32_0 : i32, i32
  }
  func.func @transform_7(%arg0: i32, %arg1: i32) -> (i32, i32) {
    %c0_i32 = arith.constant 0 : i32
    %c0_i32_0 = arith.constant 0 : i32
    return %arg0, %c0_i32 : i32, i32
  }
}

</mosaic_0001>

<bundles_post_ra>
// kernel: tpu_custom_call.1
= control target key start
LH: loop header
LB: loop body
LE: loop exit
PB: predicated region body
PF: predicated region fallthrough
CT: control target
= control target key end

     0   :  { %12 = vsyncpa [#allocation4], 0  ;;  %s1415_s0 = inlined_call_operand.vmem [shape: bf16[128,128], index: 0, kind: input, shape index: {}]   ;;  %s1416_s1 = inlined_call_operand.vmem [shape: bf16[128,128], index: 1, kind: input, shape index: {}]   ;;  %s1417_s2 = inlined_call_operand.hbm [shape: bf16[128,128], index: 2, kind: input, shape index: {}]   ;;  %s1418_s3 = inlined_call_operand.vmem [shape: f32[128,1], index: 3, kind: input, shape index: {}]   ;;  %s1419_s4 = inlined_call_operand.hbm [shape: bf16[128,128], index: 4, kind: input, shape index: {}]   ;;  %s1420_s5 = inlined_call_operand.hbm [shape: bf16[128,128], index: 5, kind: input, shape index: {}]   ;;  %s1421_s6 = inlined_call_operand.vmem [shape: f32[1,128], index: 6, kind: input, shape index: {}]   ;;  %s1422_s7 = inlined_call_operand.hbm [shape: bf16[128,128], index: 7, kind: output, shape index: {}]  }
   0x1   :  { %13 = vsyncpa [#allocation7], 0 }
   0x2   :  { %14 = vsyncpa [#allocation5], 0  ;;  %s38_s26 = sshll.u32 %s1419_s4, 4  ;;  %s1227_s27 = smov [#allocation6]   ;;  %s39_s26 = int_to_ptr.hbm [resolvable:$true] %s38_s26 }
   0x3   :  { %s40_s28 = sshll.u32 %s1227_s27, 4  ;;  %s23_s8 = sshll.u32 %s1417_s2, 4  ;;  %s41_s28 = int_to_ptr.vmem [resolvable:$true] %s40_s28  ;;  %s24_s8 = int_to_ptr.hbm [resolvable:$true] %s23_s8 }
   0x4   :  { %s1228_s9 = smov 64   ;;  %s1229_s10 = smov 4  }
   0x5   :  { %46 = dma.hbm_to_vmem [thread:$0]  %s39_s26, 1024, %s41_s28, [#allocation7], %s1228_s9, %s1228_s9, %s1229_s10  }
   0x6   :  { %s1230_s11 = smov [#allocation3]   ;;  %s51_s4 = sshll.u32 %s1420_s5, 4  ;;  %s52_s4 = int_to_ptr.hbm [resolvable:$true] %s51_s4 }
   0x7   :  { %s25_s12 = sshll.u32 %s1230_s11, 4  ;;  %s1231_s2 = smov [#allocation8]   ;;  %s26_s12 = int_to_ptr.vmem [resolvable:$true] %s25_s12 }
   0x8   :  { %31 = dma.hbm_to_vmem [thread:$0]  %s24_s8, 1024, %s26_s12, [#allocation4], %s1228_s9, %s1228_s9, %s1229_s10  }
   0x9   :  { %s53_s15 = sshll.u32 %s1231_s2, 4  ;;  %s54_s15 = int_to_ptr.vmem [resolvable:$true] %s53_s15 }
   0xa   :  { %59 = dma.hbm_to_vmem [thread:$0]  %s52_s4, 1024, %s54_s15, [#allocation7], %s1228_s9, %s1228_s9, %s1229_s10  }
   0xb   :  { %1221 = dma.done.wait [#allocation4], 1024  }
   0xc   :  { %1222 = vsyncadd [#allocation4], 4294966272 }
   0xd   :  { %1223 = dma.done.wait [#allocation7], 2048  }
   0xe   :  { %1224 = vsyncadd [#allocation7], 4294965248  ;;  %v1232_v0 = vmov 0   ;;  %v1010_v1 = vld [vmem:[%s1416_s1 + $0x38] sm:$0xff]  ;;  %v343_v2 = vld [vmem:[%s1418_s3] sm:$0xff] }
   0xf   :  { %1121 = vset.pattern.permute.xlu0 %v1232_v0  ;;  %1122 = vset.pattern.permute.xlu1 %v1232_v0  ;;  %v1009_v3 = vld [vmem:[%s1416_s1 + $0x30] sm:$0xff]  ;;  %v1008_v5 = vld [vmem:[%s1416_s1 + $0x28] sm:$0xff]  ;;  %v346_v7 = vld [vmem:[%s1418_s3 + $0x18] sm:$0xff] }
  0x10   :  { %1123 = vset.pattern.permute.xlu2 %v1232_v0  ;;  %361 = vperm.xlu0 %1121, %v343_v2   ;;  %v345_v4 = vld [vmem:[%s1418_s3 + $0x10] sm:$0xff]  ;;  %v344_v6 = vld [vmem:[%s1418_s3 + $0x8] sm:$0xff]  ;;  %v1007_v8 = vld [vmem:[%s1416_s1 + $0x20] sm:$0xff] }
  0x11   :  { %243 = vmatpush.bf16.msra.mxu0 %v1010_v1  ;;  %1090 = vmatpush.bf16.msra.mxu3 %v1010_v1  ;;  %v1006_v9 = vld [vmem:[%s1416_s1 + $0x18] sm:$0xff]  ;;  %v349_v10 = vld [vmem:[%s1418_s3 + $0x30] sm:$0xff]  ;;  %v347_v12 = vld [vmem:[%s1418_s3 + $0x20] sm:$0xff] }
  0x12   :  { %371 = vperm.xlu1 %1122, %v345_v4   ;;  %v350_v11 = vld [vmem:[%s1418_s3 + $0x38] sm:$0xff]  ;;  %v1005_v13 = vld [vmem:[%s1416_s1 + $0x10] sm:$0xff]  ;;  %381 = vperm.xlu2 %1123, %v347_v12   ;;  %v1004_v14 = vld [vmem:[%s1416_s1 + $0x8] sm:$0xff] }
  0x13   :  { %v352_v15 = vld [vmem:[%s1418_s3 + $0x48] sm:$0xff]  ;;  %v355_v16 = vld [vmem:[%s1418_s3 + $0x60] sm:$0xff]  ;;  %v1017_v19 = vld [vmem:[%s1415_s0 + $0x30] sm:$0xff] }
  0x14   :  { %v1003_v17 = vld [vmem:[%s1416_s1] sm:$0xff]  ;;  %v353_v20 = vld [vmem:[%s1418_s3 + $0x50] sm:$0xff]  ;;  %v354_v21 = vld [vmem:[%s1418_s3 + $0x58] sm:$0xff]  ;;  %s827_s1 = sshll.u32 %s1422_s7, 4  ;;  %s828_s1 = int_to_ptr.hbm [resolvable:$true] %s827_s1 }
  0x15   :  { %244 = vmatpush.bf16.msra.mxu0 %v1009_v3  ;;  %1091 = vmatpush.bf16.msra.mxu3 %v1009_v3  ;;  %v1011_v18 = vld [vmem:[%s1415_s0] sm:$0xff]  ;;  %v348_v22 = vld [vmem:[%s1418_s3 + $0x28] sm:$0xff]  ;;  %v358_v23 = vld [vmem:[%s1418_s3 + $0x78] sm:$0xff] }
  0x16   :  { %v351_v24 = vld [vmem:[%s1418_s3 + $0x40] sm:$0xff]  ;;  %v1012_v25 = vld [vmem:[%s1415_s0 + $0x8] sm:$0xff]  ;;  %v1018_v26 = vld [vmem:[%s1415_s0 + $0x38] sm:$0xff] }
  0x17   :  { %v356_v27 = vld [vmem:[%s1418_s3 + $0x68] sm:$0xff]  ;;  %v1013_v28 = vld [vmem:[%s1415_s0 + $0x10] sm:$0xff]  ;;  %v1014_v30 = vld [vmem:[%s1415_s0 + $0x18] sm:$0xff] }
  0x18   :  { %366 = vperm.xlu0 %1121, %v344_v6   ;;  %v357_v29 = vld [vmem:[%s1418_s3 + $0x70] sm:$0xff]  ;;  %v1042_v31 = vld [vmem:[#allocation8 + $0x38] sm:$0xff]  ;;  %v1040_v33 = vld [vmem:[#allocation8 + $0x28] sm:$0xff] }
  0x19   :  { %245 = vmatpush.bf16.msra.mxu0 %v1008_v5  ;;  %1092 = vmatpush.bf16.msra.mxu3 %v1008_v5  ;;  %v1041_v32 = vld [vmem:[#allocation8 + $0x30] sm:$0xff]  ;;  %v1039_v34 = vld [vmem:[#allocation8 + $0x20] sm:$0xff]  ;;  %v1038_v36 = vld [vmem:[#allocation8 + $0x18] sm:$0xff] }
  0x1a   :  { %376 = vperm.xlu1 %1122, %v346_v7   ;;  %386 = vperm.xlu2 %1123, %v348_v22   ;;  %v1015_v35 = vld [vmem:[%s1415_s0 + $0x20] sm:$0xff]  ;;  %v1037_v37 = vld [vmem:[#allocation8 + $0x10] sm:$0xff]  ;;  %v1026_v38 = vld [vmem:[#allocation6 + $0x38] sm:$0xff] }
  0x1b   :  { %607 = vmatpush.bf16.msra.mxu1 %v1042_v31  ;;  %704 = vmatpush.bf16.msra.mxu2 %v1026_v38  ;;  %v1036_v39 = vld [vmem:[#allocation8 + $0x8] sm:$0xff]  ;;  %v1035_v40 = vld [vmem:[#allocation8] sm:$0xff]  ;;  %v1025_v41 = vld [vmem:[#allocation6 + $0x30] sm:$0xff] }
  0x1c   :  { %v1016_v42 = vld [vmem:[%s1415_s0 + $0x28] sm:$0xff]  ;;  %v1033_v43 = vld [vmem:[#allocation3 + $0x30] sm:$0xff]  ;;  %v1023_v45 = vld [vmem:[#allocation6 + $0x20] sm:$0xff] }
  0x1d   :  { %246 = vmatpush.bf16.msra.mxu0 %v1007_v8  ;;  %1093 = vmatpush.bf16.msra.mxu3 %v1007_v8  ;;  %v1024_v44 = vld [vmem:[#allocation6 + $0x28] sm:$0xff]  ;;  %v1022_v46 = vld [vmem:[#allocation6 + $0x18] sm:$0xff]  ;;  %v1021_v47 = vld [vmem:[#allocation6 + $0x10] sm:$0xff] }
  0x1e   :  { %v1034_v48 = vld [vmem:[#allocation3 + $0x38] sm:$0xff]  ;;  %v1020_v49 = vld [vmem:[#allocation6 + $0x8] sm:$0xff]  ;;  %v1019_v50 = vld [vmem:[#allocation6] sm:$0xff] }
  0x1f   :  { %608 = vmatpush.bf16.msra.mxu1 %v1041_v32  ;;  %705 = vmatpush.bf16.msra.mxu2 %v1025_v41  ;;  %v1027_v51 = vld [vmem:[#allocation3] sm:$0xff]  ;;  %v1028_v58 = vld [vmem:[#allocation3 + $0x8] sm:$0xff]  ;;  %v1029_v3 = vld [vmem:[#allocation3 + $0x10] sm:$0xff] }
  0x20   :  { %391 = vperm.xlu0 %1121, %v349_v10  }
  0x21   :  { %247 = vmatpush.bf16.msra.mxu0 %v1006_v9  ;;  %1094 = vmatpush.bf16.msra.mxu3 %v1006_v9 }
  0x22   :  { %396 = vperm.xlu1 %1122, %v350_v11   ;;  %401 = vperm.xlu2 %1123, %v351_v24  }
  0x23   :  { %609 = vmatpush.bf16.msra.mxu1 %v1040_v33  ;;  %706 = vmatpush.bf16.msra.mxu2 %v1024_v44 }
  0x25   :  { %248 = vmatpush.bf16.msra.mxu0 %v1005_v13  ;;  %1095 = vmatpush.bf16.msra.mxu3 %v1005_v13 }
  0x27   :  { %610 = vmatpush.bf16.msra.mxu1 %v1039_v34  ;;  %707 = vmatpush.bf16.msra.mxu2 %v1023_v45 }
  0x28   :  { %406 = vperm.xlu0 %1121, %v352_v15  }
  0x29   :  { %249 = vmatpush.bf16.msra.mxu0 %v1004_v14  ;;  %1096 = vmatpush.bf16.msra.mxu3 %v1004_v14 }
  0x2a   :  { %421 = vperm.xlu1 %1122, %v355_v16   ;;  %426 = vperm.xlu2 %1123, %v356_v27  }
  0x2b   :  { %611 = vmatpush.bf16.msra.mxu1 %v1038_v36  ;;  %708 = vmatpush.bf16.msra.mxu2 %v1022_v46 }
  0x2d   :  { %250 = vmatpush.bf16.msra.mxu0 %v1003_v17  ;;  %1097 = vmatpush.bf16.msra.mxu3 %v1003_v17 }
  0x2f   :  { %612 = vmatpush.bf16.msra.mxu1 %v1037_v37  ;;  %709 = vmatpush.bf16.msra.mxu2 %v1021_v47 }
  0x30   :  { %251 = vmatmul.bf16.vlgmr.msra.gmra.mxu0 %v1011_v18  ;;  %281 = vmatmul.bf16.vlgmr.msra.gmra.mxu3 %v1017_v19  ;;  %v1030_v18 = vld [vmem:[#allocation3 + $0x18] sm:$0xff] }
  0x31   :  { %411 = vperm.xlu0 %1121, %v353_v20   ;;  %1098 = vmatpush.bf16.msrb.mxu3 %v1042_v31 }
  0x32   :  { %416 = vperm.xlu1 %1122, %v354_v21   ;;  %431 = vperm.xlu2 %1123, %v357_v29  }
  0x33   :  { %613 = vmatpush.bf16.msra.mxu1 %v1036_v39  ;;  %710 = vmatpush.bf16.msra.mxu2 %v1020_v49 }
  0x35   :  { %1099 = vmatpush.bf16.msrb.mxu3 %v1041_v32 }
  0x37   :  { %614 = vmatpush.bf16.msra.mxu1 %v1035_v40  ;;  %711 = vmatpush.bf16.msra.mxu2 %v1019_v50 }
  0x39   :  { %436 = vperm.xlu0 %1121, %v358_v23   ;;  %1100 = vmatpush.bf16.msrb.mxu3 %v1040_v33 }
  0x3a   :  { %615 = vmatmul.bf16.vlgmr.msra.gmra.mxu1 %v1027_v51 }
  0x3d   :  { %1101 = vmatpush.bf16.msrb.mxu3 %v1039_v34 }
  0x40   :  { %256 = vmatmul.bf16.gmra.mxu0 %v1012_v25  ;;  %286 = vmatmul.bf16.gmra.mxu3 %v1018_v26 }
  0x41   :  { %1102 = vmatpush.bf16.msrb.mxu3 %v1038_v36  ;;  %v1032_v36 = vld [vmem:[#allocation3 + $0x28] sm:$0xff] }
  0x45   :  { %1103 = vmatpush.bf16.msrb.mxu3 %v1037_v37 }
  0x49   :  { %1104 = vmatpush.bf16.msrb.mxu3 %v1036_v39 }
  0x4a   :  { %620 = vmatmul.bf16.gmra.mxu1 %v1028_v58  ;;  %v1391_v58 = vld [vmem:[%s1421_s6] ss:$0 sm:$0xff]  ;;  %s1233_s6 = smov [#allocation9]  }
  0x4b   :  { %s825_s30 = sshll.u32 %s1233_s6, 4  ;;  %s826_s30 = int_to_ptr.vmem [resolvable:$true] %s825_s30 }
  0x4d   :  { %1105 = vmatpush.bf16.msrb.mxu3 %v1035_v40 }
  0x50   :  { %261 = vmatmul.bf16.gmra.mxu0 %v1013_v28  ;;  %645 = vmatmul.bf16.vlgmr.msrb.gmra.mxu3 %v1033_v43 }
  0x51   :  { %1106 = vmatpush.bf16.msra.mxu3 %v1026_v38 }
  0x55   :  { %1107 = vmatpush.bf16.msra.mxu3 %v1025_v41 }
  0x59   :  { %1108 = vmatpush.bf16.msra.mxu3 %v1024_v44 }
  0x5a   :  { %625 = vmatmul.bf16.gmra.mxu1 %v1029_v3 }
  0x5d   :  { %1109 = vmatpush.bf16.msra.mxu3 %v1023_v45 }
  0x60   :  { %266 = vmatmul.bf16.gmra.mxu0 %v1014_v30  ;;  %650 = vmatmul.bf16.gmra.mxu3 %v1034_v48  ;;  %v1031_v30 = vld [vmem:[#allocation3 + $0x20] sm:$0xff] }
  0x61   :  { %1110 = vmatpush.bf16.msra.mxu3 %v1022_v46 }
  0x65   :  { %1111 = vmatpush.bf16.msra.mxu3 %v1021_v47 }
  0x69   :  { %1112 = vmatpush.bf16.msra.mxu3 %v1020_v49 }
  0x6a   :  { %630 = vmatmul.bf16.gmra.mxu1 %v1030_v18 }
  0x6c   :  { %v382_v54 = vpop.permute.xlu2 %381 }
  0x6d   :  { %1113 = vmatpush.bf16.msra.mxu3 %v1019_v50 }
  0x70   :  { %271 = vmatmul.bf16.gmra.mxu0 %v1015_v35 }
  0x74   :  { %v387_v57 = vpop.permute.xlu2 %386 }
  0x7a   :  { %635 = vmatmul.bf16.gmra.mxu1 %v1031_v30 }
  0x7c   :  { %v402_v62 = vpop.permute.xlu2 %401 }
  0x80   :  { %276 = vmatmul.bf16.gmra.mxu0 %v1016_v42 }
  0x82   :  { %v362_v52 = vpop.permute.xlu0 %361 }
  0x84   :  { %v372_v53 = vpop.permute.xlu1 %371  ;;  %v427_v7 = vpop.permute.xlu2 %426 }
  0x8a   :  { %v367_v55 = vpop.permute.xlu0 %366  ;;  %640 = vmatmul.bf16.gmra.mxu1 %v1032_v36 }
  0x8c   :  { %v377_v56 = vpop.permute.xlu1 %376  ;;  %v432_v19 = vpop.permute.xlu2 %431 }
  0x92   :  { %v392_v59 = vpop.permute.xlu0 %391 }
  0x94   :  { %v397_v61 = vpop.permute.xlu1 %396 }
  0x9a   :  { %v407_v4 = vpop.permute.xlu0 %406 }
  0x9c   :  { %v422_v6 = vpop.permute.xlu1 %421 }
  0xa3   :  { %v412_v13 = vpop.permute.xlu0 %411 }
  0xa4   :  { %v417_v44 = vpop.permute.xlu1 %416 }
  0xab   :  { %v437_v22 = vpop.permute.xlu0 %436 }
  0xad   :  { %v252_v60 = vpop.f32.mrf.mxu0 }
  0xae   :  { %v439_v1 = vmul.f32 %v362_v52, %v252_v60 }
  0xb3   :  { %v282_v63 = vpop.f32.mrf.mxu3 }
  0xb4   :  { %v451_v8 = vmul.f32 %v422_v6, %v282_v63 }
  0xb5   :  { %v254_v0 = vpop.f32.mrf.mxu0 }
  0xb6   :  { %v440_v2 = vmul.f32 %v367_v55, %v254_v0 }
  0xb7   :  { %v616_v51 = vpop.f32.mrf.mxu1 }
  0xb8   :  { %v455_v5 = vpack.c.bf16 %v440_v2, %v439_v1 }
  0xba   :  { %712 = vmatmul.bf16.vlgmr.msra.gmra.mxu2 %v455_v5 }
  0xbb   :  { %v284_v9 = vpop.f32.mrf.mxu3 }
  0xbc   :  { %v452_v10 = vmul.f32 %v427_v7, %v284_v9 }
  0xbd   :  { %v257_v11 = vpop.f32.mrf.mxu0 }
  0xbe   :  { %v461_v12 = vpack.c.bf16 %v452_v10, %v451_v8  ;;  %v441_v16 = vmul.f32 %v372_v53, %v257_v11 }
  0xbf   :  { %v618_v53 = vpop.f32.mrf.mxu1 }
  0xc0   :  { %742 = vmatmul.bf16.vlgmr.msra.gmra.mxu3 %v461_v12 }
  0xc3   :  { %v287_v14 = vpop.f32.mrf.mxu3 }
  0xc4   :  { %v453_v21 = vmul.f32 %v432_v19, %v287_v14 }
  0xc5   :  { %v259_v15 = vpop.f32.mrf.mxu0 }
  0xc6   :  { %v442_v17 = vmul.f32 %v377_v56, %v259_v15 }
  0xc7   :  { %v621_v55 = vpop.f32.mrf.mxu1 }
  0xc8   :  { %v456_v20 = vpack.c.bf16 %v442_v17, %v441_v16 }
  0xca   :  { %717 = vmatmul.bf16.gmra.mxu2 %v456_v20 }
  0xcb   :  { %v289_v23 = vpop.f32.mrf.mxu3 }
  0xcc   :  { %v454_v24 = vmul.f32 %v437_v22, %v289_v23 }
  0xcd   :  { %v262_v25 = vpop.f32.mrf.mxu0 }
  0xce   :  { %v462_v26 = vpack.c.bf16 %v454_v24, %v453_v21  ;;  %v443_v28 = vmul.f32 %v382_v54, %v262_v25 }
  0xd0   :  { %747 = vmatmul.bf16.gmra.mxu3 %v462_v26 }
  0xd3   :  { %v646_v49 = vpop.f32.mrf.mxu3 }
  0xd5   :  { %v264_v27 = vpop.f32.mrf.mxu0 }
  0xd6   :  { %v444_v29 = vmul.f32 %v387_v57, %v264_v27 }
  0xd8   :  { %v457_v31 = vpack.c.bf16 %v444_v29, %v443_v28 }
  0xda   :  { %722 = vmatmul.bf16.gmra.mxu2 %v457_v31 }
  0xdb   :  { %v648_v50 = vpop.f32.mrf.mxu3 }
  0xdd   :  { %v267_v32 = vpop.f32.mrf.mxu0 }
  0xde   :  { %v445_v34 = vmul.f32 %v392_v59, %v267_v32 }
  0xe3   :  { %v651_v52 = vpop.f32.mrf.mxu3 }
  0xe5   :  { %v269_v33 = vpop.f32.mrf.mxu0 }
  0xe6   :  { %v446_v35 = vmul.f32 %v397_v61, %v269_v33  ;;  %v623_v61 = vpop.f32.mrf.mxu1 }
  0xe8   :  { %v458_v37 = vpack.c.bf16 %v446_v35, %v445_v34 }
  0xea   :  { %727 = vmatmul.bf16.gmra.mxu2 %v458_v37 }
  0xeb   :  { %v653_v54 = vpop.f32.mrf.mxu3 }
  0xed   :  { %v272_v38 = vpop.f32.mrf.mxu0 }
  0xee   :  { %v447_v40 = vmul.f32 %v402_v62, %v272_v38  ;;  %v626_v10 = vpop.f32.mrf.mxu1 }
  0xf5   :  { %v274_v39 = vpop.f32.mrf.mxu0 }
  0xf6   :  { %v448_v41 = vmul.f32 %v407_v4, %v274_v39  ;;  %v628_v21 = vpop.f32.mrf.mxu1 }
  0xf8   :  { %v459_v42 = vpack.c.bf16 %v448_v41, %v447_v40 }
  0xfa   :  { %732 = vmatmul.bf16.gmra.mxu2 %v459_v42 }
  0xfd   :  { %v277_v43 = vpop.f32.mrf.mxu0 }
  0xfe   :  { %v449_v46 = vmul.f32 %v412_v13, %v277_v43  ;;  %v631_v34 = vpop.f32.mrf.mxu1 }
 0x105   :  { %v279_v45 = vpop.f32.mrf.mxu0 }
 0x106   :  { %v450_v47 = vmul.f32 %v417_v44, %v279_v45  ;;  %v633_v42 = vpop.f32.mrf.mxu1 }
 0x108   :  { %v460_v48 = vpack.c.bf16 %v450_v47, %v449_v46 }
 0x10a   :  { %737 = vmatmul.bf16.gmra.mxu2 %v460_v48 }
 0x10e   :  { %v636_v48 = vpop.f32.mrf.mxu1 }
 0x13d   :  { %v713_v56 = vpop.f32.mrf.mxu2 }
 0x13e   :  { %v714_v57 = vadd.f32 %v713_v56, %v616_v51 }
 0x140   :  { %v757_v62 = vadd.f32 %v1391_v58, %v714_v57 }
 0x142   :  { %v773_v2 = vmax.f32 %v757_v62, 0.0 }
 0x143   :  { %v743_v59 = vpop.f32.mrf.mxu3 }
 0x144   :  { %v744_v0 = vadd.f32 %v743_v59, %v646_v49 }
 0x145   :  { %v715_v60 = vpop.f32.mrf.mxu2 }
 0x146   :  { %v716_v63 = vadd.f32 %v715_v60, %v618_v53  ;;  %v769_v5 = vadd.f32 %v1391_v58, %v744_v0 }
 0x148   :  { %v758_v1 = vadd.f32 %v1391_v58, %v716_v63  ;;  %v785_v11 = vmax.f32 %v769_v5, 0.0 }
 0x14a   :  { %v774_v3 = vmax.f32 %v758_v1, 0.0 }
 0x14b   :  { %v745_v4 = vpop.f32.mrf.mxu3 }
 0x14c   :  { %v1046_v6 = vpack.c.bf16 %v774_v3, %v773_v2  ;;  %v746_v7 = vadd.f32 %v745_v4, %v648_v50 }
 0x14d   :  { %v718_v8 = vpop.f32.mrf.mxu2 }
 0x14e   :  { %1047 = vst [vmem:[#allocation9] sm:$0xff] %v1046_v6   ;;  %v770_v9 = vadd.f32 %v1391_v58, %v746_v7  ;;  %v719_v14 = vadd.f32 %v718_v8, %v621_v55 }
 0x150   :  { %v786_v12 = vmax.f32 %v770_v9, 0.0  ;;  %v759_v17 = vadd.f32 %v1391_v58, %v719_v14 }
 0x152   :  { %v1076_v13 = vpack.c.bf16 %v786_v12, %v785_v11  ;;  %v775_v22 = vmax.f32 %v759_v17, 0.0 }
 0x153   :  { %v748_v15 = vpop.f32.mrf.mxu3 }
 0x154   :  { %1088 = vst [vmem:[#allocation9 + $0x30] sm:$0xff] %v1076_v13   ;;  %v749_v19 = vadd.f32 %v748_v15, %v651_v52 }
 0x155   :  { %v720_v16 = vpop.f32.mrf.mxu2 }
 0x156   :  { %v721_v18 = vadd.f32 %v720_v16, %v623_v61  ;;  %v771_v25 = vadd.f32 %v1391_v58, %v749_v19 }
 0x158   :  { %v760_v20 = vadd.f32 %v1391_v58, %v721_v18  ;;  %v787_v30 = vmax.f32 %v771_v25, 0.0 }
 0x15a   :  { %v776_v23 = vmax.f32 %v760_v20, 0.0 }
 0x15b   :  { %v750_v24 = vpop.f32.mrf.mxu3 }
 0x15c   :  { %v1051_v26 = vpack.c.bf16 %v776_v23, %v775_v22  ;;  %v751_v27 = vadd.f32 %v750_v24, %v653_v54  ;;  %v638_v54 = vpop.f32.mrf.mxu1 }
 0x15d   :  { %v723_v28 = vpop.f32.mrf.mxu2 }
 0x15e   :  { %1083 = vst [vmem:[#allocation9 + $0x8] sm:$0xff] %v1051_v26   ;;  %v772_v29 = vadd.f32 %v1391_v58, %v751_v27  ;;  %v724_v33 = vadd.f32 %v723_v28, %v626_v10 }
 0x160   :  { %v788_v31 = vmax.f32 %v772_v29, 0.0  ;;  %v761_v36 = vadd.f32 %v1391_v58, %v724_v33 }
 0x162   :  { %v1081_v32 = vpack.c.bf16 %v788_v31, %v787_v30  ;;  %v777_v39 = vmax.f32 %v761_v36, 0.0 }
 0x164   :  { %1089 = vst [vmem:[#allocation9 + $0x38] sm:$0xff] %v1081_v32   ;;  %v641_v63 = vpop.f32.mrf.mxu1 }
 0x165   :  { %v725_v35 = vpop.f32.mrf.mxu2 }
 0x166   :  { %v726_v37 = vadd.f32 %v725_v35, %v628_v21 }
 0x168   :  { %v762_v38 = vadd.f32 %v1391_v58, %v726_v37 }
 0x16a   :  { %v778_v40 = vmax.f32 %v762_v38, 0.0 }
 0x16c   :  { %v1056_v41 = vpack.c.bf16 %v778_v40, %v777_v39  ;;  %v643_v3 = vpop.f32.mrf.mxu1 }
 0x16d   :  { %v728_v43 = vpop.f32.mrf.mxu2 }
 0x16e   :  { %1084 = vst [vmem:[#allocation9 + $0x10] sm:$0xff] %v1056_v41   ;;  %v729_v44 = vadd.f32 %v728_v43, %v631_v34 }
 0x170   :  { %v763_v46 = vadd.f32 %v1391_v58, %v729_v44 }
 0x172   :  { %v779_v50 = vmax.f32 %v763_v46, 0.0 }
 0x175   :  { %v730_v45 = vpop.f32.mrf.mxu2 }
 0x176   :  { %v731_v47 = vadd.f32 %v730_v45, %v633_v42 }
 0x178   :  { %v764_v49 = vadd.f32 %v1391_v58, %v731_v47 }
 0x17a   :  { %v780_v51 = vmax.f32 %v764_v49, 0.0 }
 0x17c   :  { %v1061_v52 = vpack.c.bf16 %v780_v51, %v779_v50 }
 0x17d   :  { %v733_v53 = vpop.f32.mrf.mxu2 }
 0x17e   :  { %1085 = vst [vmem:[#allocation9 + $0x18] sm:$0xff] %v1061_v52   ;;  %v734_v55 = vadd.f32 %v733_v53, %v636_v48 }
 0x180   :  { %v765_v57 = vadd.f32 %v1391_v58, %v734_v55 }
 0x182   :  { %v781_v61 = vmax.f32 %v765_v57, 0.0 }
 0x185   :  { %v735_v56 = vpop.f32.mrf.mxu2 }
 0x186   :  { %v736_v59 = vadd.f32 %v735_v56, %v638_v54 }
 0x188   :  { %v766_v60 = vadd.f32 %v1391_v58, %v736_v59 }
 0x18a   :  { %v782_v62 = vmax.f32 %v766_v60, 0.0 }
 0x18c   :  { %v1066_v0 = vpack.c.bf16 %v782_v62, %v781_v61 }
 0x18d   :  { %v738_v1 = vpop.f32.mrf.mxu2 }
 0x18e   :  { %1086 = vst [vmem:[#allocation9 + $0x20] sm:$0xff] %v1066_v0   ;;  %v739_v2 = vadd.f32 %v738_v1, %v641_v63 }
 0x190   :  { %v767_v5 = vadd.f32 %v1391_v58, %v739_v2 }
 0x192   :  { %v783_v8 = vmax.f32 %v767_v5, 0.0 }
 0x195   :  { %v740_v4 = vpop.f32.mrf.mxu2 }
 0x196   :  { %v741_v6 = vadd.f32 %v740_v4, %v643_v3 }
 0x198   :  { %v768_v7 = vadd.f32 %v1391_v58, %v741_v6 }
 0x19a   :  { %v784_v9 = vmax.f32 %v768_v7, 0.0 }
 0x19c   :  { %v1071_v10 = vpack.c.bf16 %v784_v9, %v783_v8 }
 0x19e   :  { %1087 = vst [vmem:[#allocation9 + $0x28] sm:$0xff] %v1071_v10  }
 0x19f   :  { %833 = dma.vmem_to_hbm [thread:$0]  %s826_s30, 1024, %s828_s1, [#allocation5], %s1228_s9, %s1228_s9, %s1229_s10  }
 0x1a0   :  { %1225 = dma.done.wait [#allocation5], 1024  }
 0x1a1   :  { %1226 = vsyncadd [#allocation5], 4294966272 }
 0x1a2   :  { %838 = vsyncpa [#allocation4], 1 }
 0x1a3   :  { %839 = vsyncpa [#allocation7], 1 }
 0x1a4   :  { %840 = vsyncpa [#allocation5], 1 }

</bundles_post_ra>
